<compile_context>
chip_gen: v7x
topology: tpu7x:2x2x1
jax: 0.10.0
libtpu: 0.0.40
codegen_flags: <defaults>
</compile_context>

<pallas_src>
import functools

import jax
import jax.numpy as jnp
from jax.experimental import pallas as pl
from jax.experimental.pallas import tpu as pltpu

MAX_HW_TILE = 4096  # pixels (lanes) per grid step; tiny vs any VMEM limit


def _ce_partial_kernel(logits_ref, labels_ref, out_ref, *, hw_total, hw_tile):
    """Accumulates per-lane partial CE sums for one image across hw tiles.

    logits_ref: (C, hw_tile)  — classes on sublanes, pixels on lanes.
    labels_ref: (1, hw_tile)  int32, lane-dense.
    out_ref:    (1, hw_tile)  f32, resident accumulator (same block for all t).
    """
    t = pl.program_id(1)

    x = logits_ref[...].astype(jnp.float32)            # (C, hw_tile)
    lbl = labels_ref[...]                               # (1, hw_tile)

    # Numerically-stable logsumexp over the class (sublane) axis; keepdims
    # keeps everything as 2-D full-width vregs.
    m = jnp.max(x, axis=0, keepdims=True)               # (1, hw_tile)
    lse = m + jnp.log(jnp.sum(jnp.exp(x - m), axis=0, keepdims=True))

    # Logit at the label via one-hot select over the class axis.
    cls_iota = jax.lax.broadcasted_iota(jnp.int32, x.shape, 0)
    picked = jnp.sum(jnp.where(cls_iota == lbl, x, 0.0), axis=0, keepdims=True)

    loss = lse - picked                                  # (1, hw_tile)

    # Mask lanes past the end of the image (remainder of the last tile).
    lane = jax.lax.broadcasted_iota(jnp.int32, loss.shape, 1)
    valid = (t * hw_tile + lane) < hw_total
    loss = jnp.where(valid, loss, 0.0)

    @pl.when(t == 0)
    def _():
        out_ref[...] = jnp.zeros_like(out_ref)

    out_ref[...] += loss


@jax.jit
def multiclass_cross_entropy(preds_nchw, labels_nhw):
    """Mean cross-entropy loss, matching nn.CrossEntropyLoss defaults."""
    n, c, h, w = preds_nchw.shape
    hw = h * w
    p = n * hw

    # Free reshapes only — no transpose, no extra HBM pass over the logits.
    logits = preds_nchw.reshape(n, c, hw)
    labels = labels_nhw.reshape(n, 1, hw).astype(jnp.int32)

    # Lane-tile choice: multiples of 128 when possible, else the full row
    # (block dim == array dim is always legal); remainder handled in-kernel.
    if hw % 128 == 0:
        hw_tile = min(MAX_HW_TILE, hw)
    else:
        hw_tile = hw if hw <= MAX_HW_TILE else MAX_HW_TILE
    n_tiles = pl.cdiv(hw, hw_tile)

    kernel = functools.partial(_ce_partial_kernel, hw_total=hw, hw_tile=hw_tile)

    partial = pl.pallas_call(
        kernel,
        out_shape=jax.ShapeDtypeStruct((n, 1, hw_tile), jnp.float32),
        grid_spec=pltpu.PrefetchScalarGridSpec(
            num_scalar_prefetch=0,
            grid=(n, n_tiles),
            in_specs=[
                # logits: classes on sublanes (full dim), pixels on lanes
                pl.BlockSpec((None, c, hw_tile), lambda ni, ti: (ni, 0, ti)),
                # labels: lane-dense int32
                pl.BlockSpec((None, 1, hw_tile), lambda ni, ti: (ni, 0, ti)),
            ],
            # Same output block across the t axis -> resident VMEM accumulator.
            out_specs=pl.BlockSpec((None, 1, hw_tile), lambda ni, ti: (ni, 0, 0)),
        ),
        compiler_params=pltpu.CompilerParams(
            dimension_semantics=("parallel", "arbitrary"),
        ),
    )(logits, labels)

    # Single final reduction + mean (one tiny XLA op).
    return jnp.sum(partial) / jnp.float32(p)


def _reference_loss(preds_nchw, labels_nhw):
    """Pure-JAX reference of nn.CrossEntropyLoss (mean reduction)."""
    n, c, h, w = preds_nchw.shape
    logits = jnp.transpose(preds_nchw, (0, 2, 3, 1)).reshape(-1, c).astype(jnp.float32)
    labels = labels_nhw.reshape(-1).astype(jnp.int32)
    logz = jax.scipy.special.logsumexp(logits, axis=-1)
    picked = jnp.take_along_axis(logits, labels[:, None], axis=-1)[:, 0]
    return jnp.mean(logz - picked)


if __name__ == "__main__":
    key = jax.random.PRNGKey(0)
    k1, k2 = jax.random.split(key)

    N, C, H, W = 2, 4, 16, 16
    preds = jax.random.normal(k1, (N, C, H, W), dtype=jnp.float32)
    labels = jax.random.randint(k2, (N, H, W), 0, C, dtype=jnp.int32)

    loss = jax.block_until_ready(multiclass_cross_entropy(preds, labels))
    ref = _reference_loss(preds, labels)
    assert jnp.allclose(loss, ref, rtol=1e-5, atol=1e-5), (loss, ref)

    print("KERNEL_OK")
</pallas_src>

<mosaic_0001>
module attributes {stable_mosaic.version = 11 : i64} {
  func.func @_ce_partial_kernel(%arg0: i32, %arg1: i32, %arg2: memref<1x4x256xf32, #tpu.memory_space<vmem>>, %arg3: memref<1x1x256xi32, #tpu.memory_space<vmem>>, %arg4: memref<1x1x256xf32, #tpu.memory_space<vmem>>) attributes {dimension_semantics = [#tpu.dimension_semantics<parallel>, #tpu.dimension_semantics<arbitrary>], iteration_bounds = array<i64: 2, 1>, scalar_prefetch = 0 : i64, scratch_operands = 0 : i64, tpu.core_type = #tpu.core_type<tc>, window_params = [{transform_indices = @transform_0, window_bounds = array<i64: 1, 4, 256>}, {transform_indices = @transform_1, window_bounds = array<i64: 1, 1, 256>}, {transform_indices = @transform_2, window_bounds = array<i64: 1, 1, 256>}]} {
    %c0 = arith.constant 0 : index
    %c0_0 = arith.constant 0 : index
    %c0_1 = arith.constant 0 : index
    %0 = vector.load %arg2[%c0, %c0_0, %c0_1] : memref<1x4x256xf32, #tpu.memory_space<vmem>>, vector<1x4x256xf32>
    %1 = vector.shape_cast %0 : vector<1x4x256xf32> to vector<4x256xf32>
    %c0_2 = arith.constant 0 : index
    %c0_3 = arith.constant 0 : index
    %c0_4 = arith.constant 0 : index
    %2 = vector.load %arg3[%c0_2, %c0_3, %c0_4] : memref<1x1x256xi32, #tpu.memory_space<vmem>>, vector<1x1x256xi32>
    %3 = vector.shape_cast %2 : vector<1x1x256xi32> to vector<1x256xi32>
    %cst = arith.constant dense<0xFF800000> : vector<256xf32>
    %4 = vector.multi_reduction <maximumf>, %1, %cst [0] : vector<4x256xf32> to vector<256xf32>
    %5 = vector.shape_cast %4 : vector<256xf32> to vector<1x256xf32>
    %6 = vector.broadcast %5 : vector<1x256xf32> to vector<4x256xf32>
    %7 = arith.subf %1, %6 : vector<4x256xf32>
    %8 = math.exp %7 : vector<4x256xf32>
    %cst_5 = arith.constant dense<0.000000e+00> : vector<256xf32>
    %9 = vector.multi_reduction <add>, %8, %cst_5 [0] : vector<4x256xf32> to vector<256xf32>
    %10 = vector.shape_cast %9 : vector<256xf32> to vector<1x256xf32>
    %11 = math.log %10 : vector<1x256xf32>
    %12 = arith.addf %5, %11 : vector<1x256xf32>
    %13 = tpu.iota {dimensions = array<i32: 0>} : vector<4x256xi32>
    %14 = vector.broadcast %3 : vector<1x256xi32> to vector<4x256xi32>
    %15 = arith.cmpi eq, %13, %14 : vector<4x256xi32>
    %cst_6 = arith.constant 0.000000e+00 : f32
    %16 = vector.broadcast %cst_6 : f32 to vector<4x256xf32>
    %17 = arith.select %15, %1, %16 : vector<4x256xi1>, vector<4x256xf32>
    %cst_7 = arith.constant dense<0.000000e+00> : vector<256xf32>
    %18 = vector.multi_reduction <add>, %17, %cst_7 [0] : vector<4x256xf32> to vector<256xf32>
    %19 = vector.shape_cast %18 : vector<256xf32> to vector<1x256xf32>
    %20 = arith.subf %12, %19 : vector<1x256xf32>
    %21 = tpu.iota {dimensions = array<i32: 1>} : vector<1x256xi32>
    %c256_i32 = arith.constant 256 : i32
    %22 = arith.muli %arg1, %c256_i32 : i32
    %23 = vector.broadcast %22 : i32 to vector<1x256xi32>
    %24 = arith.addi %23, %21 : vector<1x256xi32>
    %c256_i32_8 = arith.constant 256 : i32
    %25 = vector.broadcast %c256_i32_8 : i32 to vector<1x256xi32>
    %26 = arith.cmpi slt, %24, %25 : vector<1x256xi32>
    %cst_9 = arith.constant 0.000000e+00 : f32
    %27 = vector.broadcast %cst_9 : f32 to vector<1x256xf32>
    %28 = arith.select %26, %20, %27 : vector<1x256xi1>, vector<1x256xf32>
    %c0_i32 = arith.constant 0 : i32
    %29 = arith.cmpi eq, %arg1, %c0_i32 : i32
    %30 = arith.extui %29 : i1 to i32
    %c0_i32_10 = arith.constant 0 : i32
    %31 = arith.cmpi ne, %30, %c0_i32_10 : i32
    scf.if %31 {
      %cst_17 = arith.constant 0.000000e+00 : f32
      %38 = vector.broadcast %cst_17 : f32 to vector<1x256xf32>
      %c0_18 = arith.constant 0 : index
      %c0_19 = arith.constant 0 : index
      %c0_20 = arith.constant 0 : index
      %39 = vector.load %arg4[%c0_18, %c0_19, %c0_20] : memref<1x1x256xf32, #tpu.memory_space<vmem>>, vector<1x1x256xf32>
      %40 = vector.shape_cast %39 : vector<1x1x256xf32> to vector<1x256xf32>
      %41 = vector.shape_cast %38 : vector<1x256xf32> to vector<1x1x256xf32>
      tpu.vector_store %arg4[%c0_18, %c0_19, %c0_20], %41 {strides = array<i32>} : memref<1x1x256xf32, #tpu.memory_space<vmem>>, vector<1x1x256xf32>,
    } else {
    }
    %c0_11 = arith.constant 0 : index
    %c0_12 = arith.constant 0 : index
    %c0_13 = arith.constant 0 : index
    %32 = vector.load %arg4[%c0_11, %c0_12, %c0_13] : memref<1x1x256xf32, #tpu.memory_space<vmem>>, vector<1x1x256xf32>
    %33 = vector.shape_cast %32 : vector<1x1x256xf32> to vector<1x256xf32>
    %34 = arith.addf %33, %28 : vector<1x256xf32>
    %c0_14 = arith.constant 0 : index
    %c0_15 = arith.constant 0 : index
    %c0_16 = arith.constant 0 : index
    %35 = vector.load %arg4[%c0_14, %c0_15, %c0_16] : memref<1x1x256xf32, #tpu.memory_space<vmem>>, vector<1x1x256xf32>
    %36 = vector.shape_cast %35 : vector<1x1x256xf32> to vector<1x256xf32>
    %37 = vector.shape_cast %34 : vector<1x256xf32> to vector<1x1x256xf32>
    tpu.vector_store %arg4[%c0_14, %c0_15, %c0_16], %37 {strides = array<i32>} : memref<1x1x256xf32, #tpu.memory_space<vmem>>, vector<1x1x256xf32>,
    return
  }
  func.func @transform_0(%arg0: i32, %arg1: i32) -> (i32, i32, i32) {
    %c0_i32 = arith.constant 0 : i32
    %c0_i32_0 = arith.constant 0 : i32
    return %arg0, %c0_i32, %arg1 : i32, i32, i32
  }
  func.func @transform_1(%arg0: i32, %arg1: i32) -> (i32, i32, i32) {
    %c0_i32 = arith.constant 0 : i32
    %c0_i32_0 = arith.constant 0 : i32
    return %arg0, %c0_i32, %arg1 : i32, i32, i32
  }
  func.func @transform_2(%arg0: i32, %arg1: i32) -> (i32, i32, i32) {
    %c0_i32 = arith.constant 0 : i32
    %c0_i32_0 = arith.constant 0 : i32
    %c0_i32_1 = arith.constant 0 : i32
    return %arg0, %c0_i32, %c0_i32_0 : i32, i32, i32
  }
}

</mosaic_0001>

<bundles_post_ra>
// kernel: multiclass_cross_entropy.1
= control target key start
LH: loop header
LB: loop body
LE: loop exit
PB: predicated region body
PF: predicated region fallthrough
CT: control target
= control target key end

     0   :  { %s496_s9 = smov 0   ;;  %s498_s10 = smov 0   ;;  %s555_s0 = inlined_call_operand.vmem [shape: f32[2,4,256], index: 0, kind: input, shape index: {}]   ;;  %s556_s1 = inlined_call_operand.vmem [shape: s32[2,1,256], index: 1, kind: input, shape index: {}]   ;;  %s557_s2 = inlined_call_operand.vmem [shape: f32[2,1,256], index: 2, kind: output, shape index: {}]  }
   0x1   :  { %s500_s11 = smov 0  }
   0x2 LB: > { %s24_s12 = sadd.s32 1, %s473_s10  ;;  %p414_p0 = scmp.ge.s32.totalorder %s477_s11, 1  ;;  %s477_s11 = sphi %s500_s11, %s12_s11   ;;  %s473_s10 = sphi %s498_s10, %s561_s10   ;;  %s469_s9 = sphi %s496_s9, %s560_s9  }
   0x3   : > { %p26_p1 = scmp.ge.s32.totalorder %s24_s12, 2  ;;  %p147_p2 = scmp.lt.s32.totalorder %s477_s11, 3 }
   0x5   : > { %s563_s12 = smov (%p26_p1, %s24_s12), 0  ;;  %p148_p3 = pnand %p414_p0, %p147_p2 }
   0x6   : > { %p181_p4 = scmp.lt.s32.totalorder (!%p148_p3), %s469_s9, 1  ;;  %v253_v0 = vlaneseq (!%p148_p3)  ;;  %vm208_vm0 = vcmask (!%p148_p3), 1043456   ;;  %v479_v5 = vmov (!%p148_p3), 0.0   ;;  %v480_v58 = vmov (!%p148_p3), 1966171168  }
   0x7   : > { %151 = sbr.rel (%p148_p3) target bundleno = 91 (0x5b), region = 28  ;;  %v308_v59 = vunpack.c.l.s4 (!%p148_p3), %v480_v58 }
   0x8   : > { %vm517_vm1 = vcmp.lt.s32.totalorder (!%p148_p3), %v253_v0, 256  ;;  %v254_v20 = vshrl.u32 (!%p148_p3), %v253_v0, 7 }
   0xa   : > { %v257_v23 = vsub.s32 (!%p148_p3), 0, %v254_v20  ;;  %v261_v25 = vsub.s32 (!%p148_p3), 1, %v254_v20 }
   0xe   : > { %s565_s9 = smov (!%p181_p4, %s469_s9), 1 }
   0xf   : > { %s421_s13 = sshll.u32 %s565_s9, 3  ;;  %s417_s17 = sshll.u32 %s565_s9, 1 }
  0x10   : > { %s188_s16 = scalar_lea.vmem %s555_s0, %s421_s13  ;;  %s528_s20 = scalar_lea.vmem %s557_s2, %s417_s17 }
  0x11   : > { %v203_v2 = vld [vmem:[%s188_s16] sm:$0xff]  ;;  %302 = vst.msk [vmem:[%s528_s20] sm:$0x3] %vm517_vm1, %v479_v5  ;;  %s197_s23 = scalar_lea.vmem %s556_s1, %s417_s17 }
  0x12   : > { %v206_v3 = vcombine.high %v203_v2, %v203_v2  ;;  %v209_v4 = vsel %vm208_vm0, %v203_v2, -inf  ;;  %v204_v24 = vld [vmem:[%s197_s23] sm:$0x3] }
  0x13   : > { %v210_v6 = vrot.slane %v209_v4, 4  ;;  %v258_v26 = vrot.slane %v204_v24, %v257_v23  ;;  %v262_v27 = vrot.slane %v204_v24, %v261_v25 }
  0x14   : > { %v216_v7 = vsel %vm208_vm0, %v206_v3, -inf }
  0x15   : > { %v211_v8 = vmax.f32 %v209_v4, %v210_v6  ;;  %v217_v9 = vrot.slane %v216_v7, 4  ;;  %vm263_vm2 = vcmp.eq.s32.totalorder %v254_v20, %v258_v26  ;;  %vm264_vm3 = vcmp.eq.s32.totalorder %v254_v20, %v262_v27 }
  0x16   : > { %v265_v28 = vsel %vm263_vm2, %v203_v2, 0.0  ;;  %v266_v32 = vsel %vm264_vm3, %v206_v3, 0.0  ;;  %v309_v4 = vunpack.c.0.s8 %v308_v59 }
  0x17   : > { %v212_v10 = vrot.slane %v211_v8, 2  ;;  %v218_v11 = vmax.f32 %v216_v7, %v217_v9  ;;  %v267_v34 = vsel %vm208_vm0, %v265_v28, 0.0  ;;  %v274_v38 = vsel %vm208_vm0, %v266_v32, 0.0 }
  0x18   : > { %v268_v39 = vrot.slane %v267_v34, 4  ;;  %v275_v42 = vrot.slane %v274_v38, 4 }
  0x19   : > { %v213_v12 = vmax.f32 %v211_v8, %v212_v10  ;;  %v219_v13 = vrot.slane %v218_v11, 2  ;;  %v312_v8 = vsub.s32 %v309_v4, %v254_v20 }
  0x1a   : > { %v269_v45 = vadd.f32 %v268_v39, %v267_v34  ;;  %v276_v48 = vadd.f32 %v275_v42, %v274_v38 }
  0x1b   : > { %v214_v14 = vrot.slane %v213_v12, 1  ;;  %v220_v15 = vmax.f32 %v218_v11, %v219_v13  ;;  %v303_v11 = vld [vmem:[%s528_s20] sm:$0x3] }
  0x1c   : > { %v270_v51 = vrot.slane %v269_v45, 2  ;;  %v277_v53 = vrot.slane %v276_v48, 2 }
  0x1d   : > { %v215_v16 = vmax.f32 %v213_v12, %v214_v14  ;;  %v221_v17 = vrot.slane %v220_v15, 1 }
  0x1e   : > { %v271_v54 = vadd.f32 %v270_v51, %v269_v45  ;;  %v278_v55 = vadd.f32 %v277_v53, %v276_v48 }
  0x1f   : > { %v222_v18 = vmax.f32 %v220_v15, %v221_v17 }
  0x20   : > { %v272_v56 = vrot.slane %v271_v54, 1  ;;  %v279_v57 = vrot.slane %v278_v55, 1 }
  0x21   : > { %v225_v19 = vcombine.low %v215_v16, %v222_v18 }
  0x22   : > { %v273_v62 = vadd.f32 %v272_v56, %v271_v54  ;;  %v280_v3 = vadd.f32 %v279_v57, %v278_v55 }
  0x23   : > { %v227_v21 = vsub.f32 %v203_v2, %v225_v19 }
  0x25   : > { %v228_v22 = vmul.f32 1.442695, %v227_v21 }
  0x27   : > { %449 = vpow2.f32 %v228_v22 }
  0x31   : > { %v450_v29 = vpop.eup %449 }
  0x32   : > { %v231_v30 = vcombine.high %v450_v29, %v450_v29  ;;  %v233_v31 = vsel %vm208_vm0, %v450_v29, 0.0 }
  0x33   : > { %v234_v33 = vrot.slane %v233_v31, 4 }
  0x34   : > { %v240_v35 = vsel %vm208_vm0, %v231_v30, 0.0 }
  0x35   : > { %v235_v36 = vadd.f32 %v234_v33, %v233_v31  ;;  %v241_v37 = vrot.slane %v240_v35, 4 }
  0x37   : > { %v236_v40 = vrot.slane %v235_v36, 2  ;;  %v242_v41 = vadd.f32 %v241_v37, %v240_v35 }
  0x39   : > { %v237_v43 = vadd.f32 %v236_v40, %v235_v36  ;;  %v243_v44 = vrot.slane %v242_v41, 2 }
  0x3b   : > { %v238_v46 = vrot.slane %v237_v43, 1  ;;  %v244_v47 = vadd.f32 %v243_v44, %v242_v41 }
  0x3d   : > { %v239_v49 = vadd.f32 %v238_v46, %v237_v43  ;;  %v245_v50 = vrot.slane %v244_v47, 1 }
  0x3f   : > { %v246_v52 = vadd.f32 %v245_v50, %v244_v47  ;;  %451 = vlog2.f32 %v239_v49 }
  0x41   : > { %453 = vlog2.f32 %v246_v52 }
  0x49   : > { %v452_v60 = vpop.eup %451 }
  0x4a   : > { %v248_v61 = vmul.f32 0.6931472, %v452_v60 }
  0x4b   : > { %v454_v63 = vpop.eup %453 }
  0x4c   : > { %v250_v0 = vmul.f32 0.6931472, %v454_v63  ;;  %v251_v2 = vadd.f32 %v248_v61, %v215_v16 }
  0x4e   : > { %v252_v5 = vadd.f32 %v250_v0, %v222_v18  ;;  %v281_v6 = vsub.f32 %v251_v2, %v273_v62 }
  0x50   : > { %v282_v7 = vsub.f32 %v252_v5, %v280_v3 }
  0x52   : > { %v306_v9 = vcombine.low %v281_v6, %v282_v7 }
  0x54   : > { %v313_v10 = vrot.slane %v306_v9, %v312_v8 }
  0x56   : > { %v320_v12 = vrot.slane %v313_v10, %v312_v8 }
  0x58   : > { %v322_v13 = vadd.f32 %v320_v12, %v303_v11 }
  0x5a   : > { %327 = vst.msk [vmem:[%s528_s20] sm:$0x3] %vm517_vm1, %v322_v13 }
  0x5b PF: > { %s12_s11 = sadd.s32 1, %s477_s11   ;;  %s560_s9 = smov %s473_s10 }
  0x5c   : > { %p9_p5 = scmp.ge.s32.totalorder %s12_s11, 4   ;;  %s561_s10 = smov %s563_s12 }
  0x5e   :  { %11 = sbr.rel (!%p9_p5) target bundleno = 2 (0x2), region = 65 }

</bundles_post_ra>
